<compile_context>
chip_gen: v5e
topology: v5e:2x2
jax: 0.10.0
libtpu: 0.0.40
codegen_flags: <defaults>
</compile_context>

<pallas_src>
import jax
import jax.numpy as jnp
from jax.experimental import pallas as pl
from jax.experimental.pallas import tpu as pltpu


# --------------------------------------------------------------------------
# Kernel: lane-dense (T,1) x (1,D) broadcast multiply, streamed to HBM.
# --------------------------------------------------------------------------
def _mult_stream_kernel(gathered_ref, omega_ref, mult_ref):
    g = gathered_ref[...].astype(jnp.float32)          # (T, 1) — lane broadcast
    w = omega_ref[...].astype(jnp.float32)             # (1, D) — sublane broadcast
    mult_ref[...] = (g * w).astype(mult_ref.dtype)     # (T, D) unmasked lane-dense store


# --------------------------------------------------------------------------
# Helpers
# --------------------------------------------------------------------------
def _sublane_pack(dtype):
    """Rows per native sublane tile: f32 -> 8, bf16/f16 -> 16, int8/fp8 -> 32."""
    item = jnp.dtype(dtype).itemsize
    return 8 * max(1, 4 // max(item, 1))


def _vmem_capacity_bytes(default=64 << 20):
    """Physical VMEM of the attached TPU; conservative 64 MiB fallback."""
    try:
        return int(pltpu.get_tpu_info().vmem_capacity_bytes)
    except Exception:
        return default


# --------------------------------------------------------------------------
# Forward
# --------------------------------------------------------------------------
def sparsemixer_forward(logits, omega, *, jitter_eps=0.1, compute_balance_loss=False):
    """Eval-mode SparseMixer.forward. Returns (sample, multiplier, balance_loss)."""
    n, e = logits.shape
    d = omega.shape[0]
    out_dtype = jnp.result_type(logits.dtype, omega.dtype)   # torch promotion
    omega2 = omega.reshape(1, d)

    # --- expert-dim math on the tiny (N, E) logits: plain XLA ----------------
    # (lane-sparse with small E; keeping it out of the kernel keeps the kernel
    #  purely HBM-write bound on all generations, incl. v7x.)
    logits32 = logits.astype(jnp.float32)
    max_val = jnp.max(logits32, axis=-1, keepdims=True)                   # (N, 1)
    sample = jnp.argmax(logits32, axis=-1, keepdims=True).astype(jnp.int32)
    factor = jnp.maximum(jnp.abs(logits32), max_val)                      # (N, E)
    # multiply-form of (max_val - logits) / factor > 2*eps (factor >= 0, so the
    # inequality is preserved, incl. the factor == 0 / NaN edge case).
    mask = (max_val - logits32) > (2.0 * jitter_eps) * factor             # (N, E)
    # p.gather(argmax) == 1 / sum_unmasked(exp(logits - max_val)):
    # the argmax element is never masked and contributes exp(0) == 1.
    ex = jnp.where(mask, 0.0, jnp.exp(logits32 - max_val))                # (N, E)
    row_sum = jnp.sum(ex, axis=-1, keepdims=True)                         # (N, 1)
    gathered = 1.0 / row_sum                                              # exact divide

    # --- tile sizing against a device-derived, double-buffered VMEM budget ---
    in_item = 4                                        # gathered is streamed as f32
    out_item = jnp.dtype(out_dtype).itemsize
    sublane = max(_sublane_pack(jnp.float32), _sublane_pack(out_dtype))

    lane = 128
    lanes = lambda c: pl.cdiv(c, lane) * lane
    # VMEM bytes per token-row, double buffered (the (T,1) block pads to 128 lanes)
    bytes_per_row = 2 * (lanes(1) * in_item + lanes(d) * out_item)

    vmem_cap = _vmem_capacity_bytes()
    tile_budget = (vmem_cap * 5) // 8                  # ~40 MiB v7x, ~80 MiB v5e/v6e
    vmem_limit = int(min(tile_budget + (8 << 20), vmem_cap - (8 << 20)))

    omega_bytes = 2 * 8 * lanes(d) * jnp.dtype(omega.dtype).itemsize
    usable = max(tile_budget - omega_bytes - (1 << 20), bytes_per_row * sublane)
    vmem_rows = max(sublane, (usable // bytes_per_row) // sublane * sublane)

    n_min_pad = pl.cdiv(n, sublane) * sublane
    steps = max(1, pl.cdiv(n_min_pad, vmem_rows))
    # keep >= 4 (even) grid steps when possible so v7x's two TensorCores both
    # stream via the "parallel" token axis; also balances tile sizes.
    if n_min_pad >= 4 * sublane:
        steps = max(steps, 4)
    elif n_min_pad >= 2 * sublane:
        steps = max(steps, 2)
    if steps > 1 and steps % 2:
        steps += 1
    tile_rows = pl.cdiv(pl.cdiv(n_min_pad, steps), sublane) * sublane
    n_pad = pl.cdiv(n, tile_rows) * tile_rows
    grid = (n_pad // tile_rows,)

    gathered_p = gathered if n_pad == n else jnp.pad(gathered, ((0, n_pad - n), (0, 0)))

    multiplier = pl.pallas_call(
        _mult_stream_kernel,
        out_shape=jax.ShapeDtypeStruct((n_pad, d), out_dtype),
        grid=grid,
        in_specs=[
            pl.BlockSpec((tile_rows, 1), lambda i: (i, 0)),   # gathered (f32)
            pl.BlockSpec((1, d), lambda i: (0, 0)),           # omega (constant tile)
        ],
        out_specs=pl.BlockSpec((tile_rows, d), lambda i: (i, 0)),
        compiler_params=pltpu.CompilerParams(
            dimension_semantics=("parallel",),
            vmem_limit_bytes=vmem_limit),
        cost_estimate=pl.CostEstimate(
            flops=int(n_pad) * int(d),
            transcendentals=0,
            bytes_accessed=int(n_pad) * in_item
                           + int(d) * jnp.dtype(omega.dtype).itemsize
                           + int(n_pad) * int(d) * out_item),
    )(gathered_p, omega2)

    if n_pad != n:
        multiplier = multiplier[:n]

    if compute_balance_loss:
        p = ex / row_sum                                              # (N, E)
        counts = jnp.sum(jax.nn.one_hot(sample[:, 0], e, dtype=jnp.float32), axis=0)
        f = counts / (jnp.sum(counts) + 1e-6)
        pmean = jnp.mean(p, axis=0)
        balance_loss = e * jnp.sum(pmean * f)
    else:
        balance_loss = jnp.float32(0.0)

    return sample, multiplier, balance_loss


# --------------------------------------------------------------------------
# Plain-JAX reference of the eval-mode torch forward (for verification)
# --------------------------------------------------------------------------
def _reference_forward(logits, omega, jitter_eps=0.1):
    max_val = jnp.max(logits, axis=-1, keepdims=True)
    max_ind = jnp.argmax(logits, axis=-1, keepdims=True).astype(jnp.int32)
    factor = jnp.maximum(jnp.abs(logits), max_val)
    mask = (max_val - logits) / factor > 2.0 * jitter_eps
    masked = jnp.where(mask, -jnp.inf, logits)
    p = jax.nn.softmax(masked, axis=-1)
    gathered = jnp.take_along_axis(p, max_ind, axis=-1)
    return max_ind, gathered * omega[None, :]


if __name__ == "__main__":
    num_tokens = 16      # e.g. batch=2 x seq=8 tokens, pre-flattened
    num_experts = 8
    embed_dim = 128      # lane-dense multiplier output
    jitter_eps = 0.1

    key = jax.random.PRNGKey(0)
    logits = jax.random.normal(key, (num_tokens, num_experts), dtype=jnp.float32)
    # omega parameter initialized as in __init__: torch.ones(embed_dim)
    omega = jnp.ones((embed_dim,), dtype=jnp.float32)

    sample, multiplier, balance_loss = sparsemixer_forward(
        logits, omega, jitter_eps=jitter_eps)
    jax.block_until_ready((sample, multiplier, balance_loss))

    ref_sample, ref_mult = _reference_forward(logits, omega, jitter_eps)
    assert sample.shape == (num_tokens, 1)
    assert multiplier.shape == (num_tokens, embed_dim)
    assert multiplier.dtype == jnp.float32
    assert jnp.array_equal(sample, ref_sample)
    # exact divide + exact f32 multiply: tolerance can be tight
    assert jnp.allclose(multiplier, ref_mult, atol=1e-6, rtol=1e-6)

    print("KERNEL_OK")
</pallas_src>

<mosaic_0001>
module attributes {stable_mosaic.version = 11 : i64} {
  func.func @_mult_stream_kernel(%arg0: i32, %arg1: memref<8x1xf32, #tpu.memory_space<vmem>>, %arg2: memref<1x128xf32, #tpu.memory_space<vmem>>, %arg3: memref<8x128xf32, #tpu.memory_space<vmem>>) attributes {dimension_semantics = [#tpu.dimension_semantics<parallel>], iteration_bounds = array<i64: 2>, scalar_prefetch = 0 : i64, scratch_operands = 0 : i64, tpu.core_type = #tpu.core_type<tc>, window_params = [{transform_indices = @transform_0, window_bounds = array<i64: 8, 1>}, {pipeline_mode = #tpu.pipeline_mode<synchronous>, transform_indices = @transform_1, window_bounds = array<i64: 1, 128>}, {transform_indices = @transform_2, window_bounds = array<i64: 8, 128>}]} {
    %c0 = arith.constant 0 : index
    %c0_0 = arith.constant 0 : index
    %0 = vector.load %arg1[%c0, %c0_0] : memref<8x1xf32, #tpu.memory_space<vmem>>, vector<8x1xf32>
    %c0_1 = arith.constant 0 : index
    %c0_2 = arith.constant 0 : index
    %1 = vector.load %arg2[%c0_1, %c0_2] : memref<1x128xf32, #tpu.memory_space<vmem>>, vector<1x128xf32>
    %2 = vector.broadcast %0 : vector<8x1xf32> to vector<8x128xf32>
    %3 = vector.broadcast %1 : vector<1x128xf32> to vector<8x128xf32>
    %4 = arith.mulf %2, %3 : vector<8x128xf32>
    %c0_3 = arith.constant 0 : index
    %c0_4 = arith.constant 0 : index
    %5 = vector.load %arg3[%c0_3, %c0_4] : memref<8x128xf32, #tpu.memory_space<vmem>>, vector<8x128xf32>
    tpu.vector_store %arg3[%c0_3, %c0_4], %4 {strides = array<i32>} : memref<8x128xf32, #tpu.memory_space<vmem>>, vector<8x128xf32>,
    return
  }
  func.func @transform_0(%arg0: i32) -> (i32, i32) {
    %c0_i32 = arith.constant 0 : i32
    %c0_i32_0 = arith.constant 0 : i32
    return %arg0, %c0_i32 : i32, i32
  }
  func.func @transform_1(%arg0: i32) -> (i32, i32) {
    %c0_i32 = arith.constant 0 : i32
    %c0_i32_0 = arith.constant 0 : i32
    %c0_i32_1 = arith.constant 0 : i32
    return %c0_i32, %c0_i32_0 : i32, i32
  }
  func.func @transform_2(%arg0: i32) -> (i32, i32) {
    %c0_i32 = arith.constant 0 : i32
    %c0_i32_0 = arith.constant 0 : i32
    return %arg0, %c0_i32 : i32, i32
  }
}

</mosaic_0001>

<bundles_post_ra>
// kernel: tpu_custom_call.1
= control target key start
LH: loop header
LB: loop body
LE: loop exit
PB: predicated region body
PF: predicated region fallthrough
CT: control target
= control target key end

     0   :  { %7 = vsyncpa [#allocation3], 0  ;;  %s446_s0 = inlined_call_operand.vmem [shape: f32[16,1], index: 0, kind: input, shape index: {}]   ;;  %s447_s1 = inlined_call_operand.vmem [shape: f32[1,128], index: 1, kind: input, shape index: {}]   ;;  %s448_s2 = inlined_call_operand.hbm [shape: f32[16,128], index: 2, kind: output, shape index: {}]  }
   0x1   :  { %9 = vsyncpa [#allocation3 + $0x1], 0  ;;  %s358_s9 = smov 0   ;;  %s360_s10 = smov 0  }
   0x2   :  { %s362_s11 = smov 0   ;;  %s364_s12 = smov 0  }
   0x3 LB: > { %s379_s13 = sadd.s32 4294967295, %s340_s12   ;;  %s226_s14 = sadd.s32 4294967294, %s340_s12   ;;  %s340_s12 = sphi %s364_s12, %s454_s12   ;;  %s336_s11 = sphi %s362_s11, %s453_s11   ;;  %s332_s10 = sphi %s360_s10, %s452_s10   ;;  %s328_s9 = sphi %s358_s9, %s451_s9  }
   0x4   : > { %s383_s15 = sadd.s32 1, %s340_s12   ;;  %s69_s16 = sadd.s32 1, %s336_s11 }
   0x5   : > { %s66_s17 = ssub.s32 %s340_s12, %s383_s15  ;;  %p79_p0 = scmp.ne.s32.totalorder %s336_s11, %s332_s10 }
   0x6   : > { %p67_p1 = scmp.eq.s32.totalorder %s66_s17, 0  ;;  %p80_p2 = scmp.eq.s32.totalorder %s379_s13, 1 }
   0x7   : > { %p85_p3 = scmp.ne.s32.totalorder %s332_s10, %s328_s9  ;;  %p86_p4 = scmp.eq.s32.totalorder %s226_s14, 1 }
   0x8   : > { %s394_s18 = scalar_select %p67_p1, %s336_s11, %s69_s16  }
   0x9   : > { %p396_p5 = por %p80_p2, %p79_p0  ;;  %p400_p6 = por %p86_p4, %p85_p3 }
   0xa   : > { %p229_p7 = scmp.ge.s32.totalorder %s340_s12, 1  ;;  %p114_p8 = scmp.lt.s32.totalorder %s340_s12, 3 }
   0xc   : > { %p115_p9 = pnand %p229_p7, %p114_p8 }
   0xd   : > { %p135_p10 = scmp.lt.s32.totalorder (!%p115_p9), %s379_s13, 1  ;;  %s132_s26 = sand.u32 (!%p115_p9), 1, %s332_s10  }
   0xe   : > { %118 = sbr.rel (%p115_p9) target bundleno = 144 (0x90), region = 28  ;;  %s230_s27 = sshll.u32 (!%p115_p9), %s132_s26, 3 }
   0xf   : > { %s233_s28 = sshll.u32 (!%p115_p9), %s379_s13, 3  ;;  %s134_s6 = scalar_lea.vmem (!%p115_p9), [#allocation2], %s230_s27 }
  0x10   : > { %s162_s3 = scalar_lea.hbm (!%p115_p9), %s448_s2, %s233_s28  ;;  %s164_s7 = sshll.u32 (!%p115_p9), %s134_s6, 4  ;;  %s165_s7 = int_to_ptr.vmem [resolvable:$true] %s164_s7 }
  0x11   : > { %s166_s8 = sshll.u32 (!%p115_p9), %s162_s3, 4  ;;  %s152_s14 = scalar_lea.sflag (!%p115_p9), [#allocation3], %s132_s26  ;;  %s167_s8 = int_to_ptr.hbm [resolvable:$true] %s166_s8 }
  0x12   : > { %s292_s16 = sshra.s32 (!%p115_p9), %s167_s8, 4  ;;  %s293_s16 = int_to_ptr.hbm [resolvable:$true] %s292_s16 }
  0x13   : > { %v342_v0 = vmov 0   ;;  %s136_s21 = scalar_select %p135_p10, %s379_s13, 1  ;;  %v277_v2 = vld [vmem:[%s447_s1] ss:$0 sm:$0xff] }
  0x14   : > { %276 = vset.pattern.permute.xlu0 %v342_v0  ;;  %s294_s13 = scalar_lea.hbm %s293_s16, 8  ;;  %p299_p0 = scmp.lt.s32.totalorder %s293_s16, %s448_s2 }
  0x15   : > { %s231_s22 = sshll.u32 %s136_s21, 3  ;;  %p295_p11 = scmp.ne.s32.totalorder %s293_s16, %s294_s13 }
  0x16   : > { %s138_s25 = scalar_lea.vmem %s446_s0, %s231_s22  ;;  %s298_s22 = scalar_lea.hbm %s448_s2, 16 }
  0x17   : > { %v139_v1 = vld [vmem:[%s138_s25] sm:$0xff]  ;;  %p296_p12 = pnand %p295_p11, %p396_p5  ;;  %p300_p1 = scmp.lt.s32.totalorder %s298_s22, %s294_s13 }
  0x18   : > { %143 = vperm.xlu0 %276, %v139_v1  }
  0x19   : > { %p297_p13 = pneg %p296_p12  ;;  %p301_p2 = por %p300_p1, %p299_p0 }
  0x1b   : > { %p302_p3 = pnand %p301_p2, %p297_p13 }
  0x8a   : > { %v144_v3 = vpop.permute.xlu0 %143 }
  0x8b   : > { %v149_v4 = vmul.f32 %v277_v2, %v144_v3 }
  0x8d   : > { %150 = vst [vmem:[%s134_s6] sm:$0xff] %v149_v4 }
  0x8e   : > { %305 = shalt.err (!%p302_p3)
}
  0x8f   : > { %236 = dma.vmem_to_hbm [thread:$0]  (%p396_p5), %s165_s7, 128, %s167_s8, %s152_s14  }
  0x90 PF: > { %p242_p4 = scmp.ge.s32.totalorder %s340_s12, 2  ;;  %s178_s25 = sand.u32 1, %s328_s9  }
  0x91   : > { %s179_s26 = scalar_lea.sflag [#allocation3], %s178_s25 }
  0x92   : > { %p239_p7 = pnand %p242_p4, %p400_p6 }
  0x94   : > { %p240_p8 = pneg %p239_p7 }
  0x96   : > { %323 = dma.done.wait (%p240_p8), %s179_s26, 128  }
  0x97   : > { %325 = vsyncadd (%p240_p8), %s179_s26, 4294967168  ;;  %p12_p9 = scmp.ge.s32.totalorder %s383_s15, 4   ;;  %s451_s9 = smov %s332_s10 }
  0x98   : > { %s452_s10 = smov %s336_s11  ;;  %s453_s11 = smov %s394_s18 }
  0x99   : > { %s454_s12 = smov %s383_s15  ;;  %14 = sbr.rel (!%p12_p9) target bundleno = 3 (0x3), region = 63 }
  0x9e   :  { %185 = vsyncpa [#allocation3], 1 }
  0x9f   :  { %187 = vsyncpa [#allocation3 + $0x1], 1 }

</bundles_post_ra>
